<compile_context>
chip_gen: v5e
topology: v5e:2x2
jax: 0.10.0
libtpu: 0.0.40
codegen_flags: <defaults>
</compile_context>

<pallas_src>
import functools

import jax
import jax.numpy as jnp
from jax.experimental import pallas as pl
from jax.experimental.pallas import tpu as pltpu

DROPOUT = 0.1
SSN_SUB_BANDS = 5
EPS = 1e-5


def _normal_block_kernel(x_ref, w2a_ref, w2b_ref, w2c_ref, ssn_b_ref,
                         w1_ref, b1_ref, wpw_ref, bpw_ref, o_ref,
                         *, dilation, use_mxu):
    _, C, F, T = o_ref.shape
    d = dilation
    f32 = jnp.float32

    x = x_ref[0].astype(f32)                                   # (C, F, T)

    # ---- f2: depthwise (3,1) SAME conv over frequency + SubSpectralNorm ----
    # SSN scale is folded into the per-(C,F) tap weights host-side; conv bias +
    # SSN bias are folded into ssn_b.  Halo rows built in-kernel (VMEM only).
    zrow = jnp.zeros((C, 1, T), f32)
    x_m1 = jnp.concatenate([zrow, x[:, :F - 1, :]], axis=1)    # x[f-1] (zero @ f=0)
    x_p1 = jnp.concatenate([x[:, 1:, :], zrow], axis=1)        # x[f+1] (zero @ f=F-1)
    x1 = (w2a_ref[...] * x_m1 + w2b_ref[...] * x
          + w2c_ref[...] * x_p1 + ssn_b_ref[...])              # (C, F, T)

    # ---- x2 = mean over frequency ----
    x2 = jnp.mean(x1, axis=1)                                  # (C, T)

    # ---- f1: depthwise (1,3) SAME conv over time, dilation d (BN folded) ----
    zcol = jnp.zeros((C, d), f32)
    t_m = jnp.concatenate([zcol, x2[:, :T - d]], axis=1)       # x2[t-d] (zero-padded)
    t_p = jnp.concatenate([x2[:, d:], zcol], axis=1)           # x2[t+d] (zero-padded)
    w1 = w1_ref[...]                                           # (C, 3)  (BN scale folded)
    y = w1[:, 0:1] * t_m + w1[:, 1:2] * x2 + w1[:, 2:3] * t_p + b1_ref[...]
    y = y * jax.nn.sigmoid(y)                                  # SiLU (EUP)

    # ---- 1x1 pointwise conv across channels (Dropout2d = eval identity) ----
    wpw = wpw_ref[...]                                         # (C, C)
    bpw = bpw_ref[...]                                         # (C, 1)
    if use_mxu:
        y = jnp.dot(wpw, y, preferred_element_type=f32) + bpw
    else:
        # Small C: a CxC MXU dot would use <1% of the systolic array; do the
        # channel mix as a broadcast multiply + sublane-axis reduction instead.
        y = jnp.sum(wpw[:, :, None] * y[None, :, :], axis=1) + bpw

    # ---- residual + ReLU, single fused store ----
    out = x + x1 + y[:, None, :]
    o_ref[0] = jnp.maximum(out, 0.0).astype(o_ref.dtype)


def normal_block_pallas(x, params, *, dilation=1):
    N, C, F, T = x.shape
    assert 1 <= dilation < T, "dilated time conv assumes dilation < T"
    assert F >= 2
    (w2, b2, ssn_scale, ssn_bias, w1d, b1d, bn_scale, bn_bias, w_pw, b_pw) = params

    # ---- host-side constant folding (zero runtime cost) ----
    # SSN: (conv + b2) * s + bias  ==  Σ_k (w2_k * s) . x_shift_k + (b2 * s + bias)
    s2 = ssn_scale[:, :, 0]                                    # (C, F)
    w2a = (w2[:, 0:1] * s2)[..., None]                         # (C, F, 1)
    w2b = (w2[:, 1:2] * s2)[..., None]                         # (C, F, 1)
    w2c = (w2[:, 2:3] * s2)[..., None]                         # (C, F, 1)
    ssn_b = b2[:, :, None] * ssn_scale + ssn_bias              # (C, F, 1)
    # BN(conv) = (w1.x + b1) * bns + bnb  ==  (w1*bns).x + (b1*bns + bnb)
    w1_eff = w1d * bn_scale                                    # (C, 3)
    b1_eff = b1d * bn_scale + bn_bias                          # (C, 1)

    use_mxu = C >= 32   # below this the VPU channel-mix beats an MXU weight push

    # ---- explicit VMEM budget (double-buffered in/out blocks + params + f32 temps) ----
    itemsize = jnp.dtype(x.dtype).itemsize
    io_block = C * F * T * itemsize
    f32_slab = C * F * T * 4
    param_bytes = 4 * (4 * C * F + 3 * C + C + C * C + C)
    vmem_est = 2 * 2 * io_block + 2 * param_bytes + 8 * f32_slab
    assert vmem_est <= 60 * 1024 * 1024, (
        f"per-step footprint {vmem_est / 2**20:.1f} MiB exceeds the v7x VMEM "
        "budget; tile the time axis with a dilation-sized halo")
    vmem_limit = int(min(max(vmem_est, 32 * 1024 * 1024), 64 * 1024 * 1024))

    kernel = functools.partial(_normal_block_kernel, dilation=dilation, use_mxu=use_mxu)
    return pl.pallas_call(
        kernel,
        out_shape=jax.ShapeDtypeStruct((N, C, F, T), x.dtype),
        grid=(N,),                                             # one batch element / step
        in_specs=[
            pl.BlockSpec((1, C, F, T), lambda i: (i, 0, 0, 0)),   # x
            pl.BlockSpec((C, F, 1), lambda i: (0, 0, 0)),         # freq tap -1 (SSN folded)
            pl.BlockSpec((C, F, 1), lambda i: (0, 0, 0)),         # freq tap  0 (SSN folded)
            pl.BlockSpec((C, F, 1), lambda i: (0, 0, 0)),         # freq tap +1 (SSN folded)
            pl.BlockSpec((C, F, 1), lambda i: (0, 0, 0)),         # SSN bias + conv bias
            pl.BlockSpec((C, 3), lambda i: (0, 0)),               # time-conv weights * BN scale
            pl.BlockSpec((C, 1), lambda i: (0, 0)),               # time-conv bias (BN folded)
            pl.BlockSpec((C, C), lambda i: (0, 0)),               # pointwise 1x1 weight
            pl.BlockSpec((C, 1), lambda i: (0, 0)),               # pointwise bias
        ],
        out_specs=pl.BlockSpec((1, C, F, T), lambda i: (i, 0, 0, 0)),
        compiler_params=pltpu.CompilerParams(
            dimension_semantics=("parallel",),
            vmem_limit_bytes=vmem_limit),
    )(x, w2a, w2b, w2c, ssn_b, w1_eff, b1_eff, w_pw, b_pw)


# ---------------- parameter construction (deterministic, in-script) ----------------
def make_params(key, C, F, S=SSN_SUB_BANDS):
    ks = jax.random.split(key, 12)
    f32 = jnp.float32

    # f2: depthwise Conv2dSamePadding(C, C, (3,1), groups=C) -> weight (C,1,3,1), bias (C,)
    w2 = 0.3 * jax.random.normal(ks[0], (C, 3), f32)
    b2 = 0.1 * jax.random.normal(ks[1], (C, 1), f32)

    # SubSpectralNorm(C, 5): BatchNorm2d(C*S) over reshaped (N, C*S, F//S, T); stats folded.
    g = 1.0 + 0.1 * jax.random.normal(ks[2], (C * S,), f32)
    b = 0.1 * jax.random.normal(ks[3], (C * S,), f32)
    rm = 0.05 * jax.random.normal(ks[4], (C * S,), f32)
    rv = 1.0 + 0.1 * jax.nn.softplus(jax.random.normal(ks[5], (C * S,), f32))
    scale_cs = g / jnp.sqrt(rv + EPS)
    bias_cs = b - rm * scale_cs
    ssn_scale = jnp.repeat(scale_cs.reshape(C, S), F // S, axis=1)[..., None]  # (C, F, 1)
    ssn_bias = jnp.repeat(bias_cs.reshape(C, S), F // S, axis=1)[..., None]    # (C, F, 1)

    # f1[0]: depthwise Conv2dSamePadding(C, C, (1,3), groups=C, dilation=(1,d))
    w1d = 0.3 * jax.random.normal(ks[6], (C, 3), f32)
    b1d = 0.1 * jax.random.normal(ks[7], (C, 1), f32)

    # f1[1]: BatchNorm2d(C) inference, folded per-channel
    g2 = 1.0 + 0.1 * jax.random.normal(ks[8], (C,), f32)
    b2n = 0.1 * jax.random.normal(ks[9], (C,), f32)
    rm2 = 0.05 * jax.random.normal(ks[10], (C,), f32)
    rv2 = 1.0 + 0.1 * jax.nn.softplus(jax.random.normal(ks[11], (C,), f32))
    bn_scale = (g2 / jnp.sqrt(rv2 + EPS))[:, None]          # (C, 1)
    bn_bias = (b2n - rm2 * (g2 / jnp.sqrt(rv2 + EPS)))[:, None]

    # f1[3]: nn.Conv2d(C, C, kernel_size=1)
    w_pw = 0.3 * jax.random.normal(jax.random.fold_in(key, 99), (C, C), f32)
    b_pw = 0.1 * jax.random.normal(jax.random.fold_in(key, 100), (C, 1), f32)

    return (w2, b2, ssn_scale, ssn_bias, w1d, b1d, bn_scale, bn_bias, w_pw, b_pw)


# ---------------- pure-JAX reference (same math, unfolded params, no Pallas) ----------------
def normal_block_ref(x, params, *, dilation=1):
    (w2, b2, ssn_scale, ssn_bias, w1d, b1d, bn_scale, bn_bias, w_pw, b_pw) = params
    N, C, F, T = x.shape
    xp = jnp.pad(x, ((0, 0), (0, 0), (1, 1), (0, 0)))
    conv_f = (w2[:, 0][None, :, None, None] * xp[:, :, 0:F, :]
              + w2[:, 1][None, :, None, None] * xp[:, :, 1:F + 1, :]
              + w2[:, 2][None, :, None, None] * xp[:, :, 2:F + 2, :]
              + b2[None, :, :, None])
    x1 = conv_f * ssn_scale[None] + ssn_bias[None]
    x2 = jnp.mean(x1, axis=2)                                    # (N, C, T)
    d = dilation
    x2p = jnp.pad(x2, ((0, 0), (0, 0), (d, d)))
    y = (w1d[None, :, 0:1] * x2p[:, :, 0:T]
         + w1d[None, :, 1:2] * x2p[:, :, d:T + d]
         + w1d[None, :, 2:3] * x2p[:, :, 2 * d:T + 2 * d]
         + b1d[None])
    y = y * bn_scale[None] + bn_bias[None]
    y = y * jax.nn.sigmoid(y)
    y = jnp.einsum('oc,nct->not', w_pw, y) + b_pw[None]
    out = x + x1 + y[:, :, None, :]
    return jnp.maximum(out, 0.0)


if __name__ == "__main__":
    N, C, F, T = 2, 4, 20, 16        # F divisible by SubSpectralNorm sub-bands (5)

    key = jax.random.PRNGKey(0)
    kx, kp = jax.random.split(key)
    x = jax.random.normal(kx, (N, C, F, T), jnp.float32)
    params = make_params(kp, C, F)

    # --- f32 activations, dilation=1 ---
    out = jax.block_until_ready(normal_block_pallas(x, params, dilation=1))
    ref = normal_block_ref(x, params, dilation=1)
    assert out.shape == (N, C, F, T) and out.dtype == x.dtype
    assert jnp.allclose(out, ref, atol=1e-4, rtol=1e-4), float(jnp.max(jnp.abs(out - ref)))

    # --- bf16 activations (halved HBM traffic), dilated path (dilation=2) ---
    x_bf = x.astype(jnp.bfloat16)
    out_bf = jax.block_until_ready(normal_block_pallas(x_bf, params, dilation=2))
    ref_bf = normal_block_ref(x_bf.astype(jnp.float32), params, dilation=2)
    assert out_bf.dtype == jnp.bfloat16
    diff = jnp.max(jnp.abs(out_bf.astype(jnp.float32) - ref_bf))
    assert jnp.allclose(out_bf.astype(jnp.float32), ref_bf, atol=5e-2, rtol=5e-2), float(diff)

    print("KERNEL_OK")
</pallas_src>

<mosaic_0001>
module attributes {stable_mosaic.version = 11 : i64} {
  func.func @_normal_block_kernel(%arg0: i32, %arg1: memref<1x4x20x16xf32, #tpu.memory_space<vmem>>, %arg2: memref<4x20x1xf32, #tpu.memory_space<vmem>>, %arg3: memref<4x20x1xf32, #tpu.memory_space<vmem>>, %arg4: memref<4x20x1xf32, #tpu.memory_space<vmem>>, %arg5: memref<4x20x1xf32, #tpu.memory_space<vmem>>, %arg6: memref<4x3xf32, #tpu.memory_space<vmem>>, %arg7: memref<4x1xf32, #tpu.memory_space<vmem>>, %arg8: memref<4x4xf32, #tpu.memory_space<vmem>>, %arg9: memref<4x1xf32, #tpu.memory_space<vmem>>, %arg10: memref<1x4x20x16xf32, #tpu.memory_space<vmem>>) attributes {dimension_semantics = [#tpu.dimension_semantics<parallel>], iteration_bounds = array<i64: 2>, scalar_prefetch = 0 : i64, scratch_operands = 0 : i64, tpu.core_type = #tpu.core_type<tc>, window_params = [{transform_indices = @transform_0, window_bounds = array<i64: 1, 4, 20, 16>}, {pipeline_mode = #tpu.pipeline_mode<synchronous>, transform_indices = @transform_1, window_bounds = array<i64: 4, 20, 1>}, {pipeline_mode = #tpu.pipeline_mode<synchronous>, transform_indices = @transform_2, window_bounds = array<i64: 4, 20, 1>}, {pipeline_mode = #tpu.pipeline_mode<synchronous>, transform_indices = @transform_3, window_bounds = array<i64: 4, 20, 1>}, {pipeline_mode = #tpu.pipeline_mode<synchronous>, transform_indices = @transform_4, window_bounds = array<i64: 4, 20, 1>}, {pipeline_mode = #tpu.pipeline_mode<synchronous>, transform_indices = @transform_5, window_bounds = array<i64: 4, 3>}, {pipeline_mode = #tpu.pipeline_mode<synchronous>, transform_indices = @transform_6, window_bounds = array<i64: 4, 1>}, {pipeline_mode = #tpu.pipeline_mode<synchronous>, transform_indices = @transform_7, window_bounds = array<i64: 4, 4>}, {pipeline_mode = #tpu.pipeline_mode<synchronous>, transform_indices = @transform_8, window_bounds = array<i64: 4, 1>}, {transform_indices = @transform_9, window_bounds = array<i64: 1, 4, 20, 16>}]} {
    %c0 = arith.constant 0 : index
    %c0_0 = arith.constant 0 : index
    %c0_1 = arith.constant 0 : index
    %c0_2 = arith.constant 0 : index
    %0 = vector.load %arg1[%c0, %c0_0, %c0_1, %c0_2] : memref<1x4x20x16xf32, #tpu.memory_space<vmem>>, vector<1x4x20x16xf32>
    %1 = vector.shape_cast %0 : vector<1x4x20x16xf32> to vector<4x20x16xf32>
    %cst = arith.constant 0.000000e+00 : f32
    %2 = vector.broadcast %cst : f32 to vector<4x1x16xf32>
    %3 = vector.extract_strided_slice %1 {offsets = [0, 0, 0], sizes = [4, 19, 16], strides = [1, 1, 1]} : vector<4x20x16xf32> to vector<4x19x16xf32>
    %4 = tpu.concatenate %2, %3 in 1 : vector<4x1x16xf32>, vector<4x19x16xf32> -> vector<4x20x16xf32>
    %5 = vector.extract_strided_slice %1 {offsets = [0, 1, 0], sizes = [4, 19, 16], strides = [1, 1, 1]} : vector<4x20x16xf32> to vector<4x19x16xf32>
    %6 = tpu.concatenate %5, %2 in 1 : vector<4x19x16xf32>, vector<4x1x16xf32> -> vector<4x20x16xf32>
    %c0_3 = arith.constant 0 : index
    %c0_4 = arith.constant 0 : index
    %c0_5 = arith.constant 0 : index
    %7 = vector.load %arg2[%c0_3, %c0_4, %c0_5] : memref<4x20x1xf32, #tpu.memory_space<vmem>>, vector<4x20x1xf32>
    %8 = vector.broadcast %7 : vector<4x20x1xf32> to vector<4x20x16xf32>
    %9 = arith.mulf %8, %4 : vector<4x20x16xf32>
    %c0_6 = arith.constant 0 : index
    %c0_7 = arith.constant 0 : index
    %c0_8 = arith.constant 0 : index
    %10 = vector.load %arg3[%c0_6, %c0_7, %c0_8] : memref<4x20x1xf32, #tpu.memory_space<vmem>>, vector<4x20x1xf32>
    %11 = vector.broadcast %10 : vector<4x20x1xf32> to vector<4x20x16xf32>
    %12 = arith.mulf %11, %1 : vector<4x20x16xf32>
    %13 = arith.addf %9, %12 : vector<4x20x16xf32>
    %c0_9 = arith.constant 0 : index
    %c0_10 = arith.constant 0 : index
    %c0_11 = arith.constant 0 : index
    %14 = vector.load %arg4[%c0_9, %c0_10, %c0_11] : memref<4x20x1xf32, #tpu.memory_space<vmem>>, vector<4x20x1xf32>
    %15 = vector.broadcast %14 : vector<4x20x1xf32> to vector<4x20x16xf32>
    %16 = arith.mulf %15, %6 : vector<4x20x16xf32>
    %17 = arith.addf %13, %16 : vector<4x20x16xf32>
    %c0_12 = arith.constant 0 : index
    %c0_13 = arith.constant 0 : index
    %c0_14 = arith.constant 0 : index
    %18 = vector.load %arg5[%c0_12, %c0_13, %c0_14] : memref<4x20x1xf32, #tpu.memory_space<vmem>>, vector<4x20x1xf32>
    %19 = vector.broadcast %18 : vector<4x20x1xf32> to vector<4x20x16xf32>
    %20 = arith.addf %17, %19 : vector<4x20x16xf32>
    %cst_15 = arith.constant dense<0.000000e+00> : vector<4x16xf32>
    %21 = vector.multi_reduction <add>, %20, %cst_15 [1] : vector<4x20x16xf32> to vector<4x16xf32>
    %cst_16 = arith.constant 2.000000e+01 : f32
    %22 = vector.broadcast %cst_16 : f32 to vector<4x16xf32>
    %23 = arith.divf %21, %22 : vector<4x16xf32>
    %cst_17 = arith.constant 0.000000e+00 : f32
    %24 = vector.broadcast %cst_17 : f32 to vector<4x1xf32>
    %25 = vector.extract_strided_slice %23 {offsets = [0, 0], sizes = [4, 15], strides = [1, 1]} : vector<4x16xf32> to vector<4x15xf32>
    %26 = tpu.concatenate %24, %25 in 1 : vector<4x1xf32>, vector<4x15xf32> -> vector<4x16xf32>
    %27 = vector.extract_strided_slice %23 {offsets = [0, 1], sizes = [4, 15], strides = [1, 1]} : vector<4x16xf32> to vector<4x15xf32>
    %28 = tpu.concatenate %27, %24 in 1 : vector<4x15xf32>, vector<4x1xf32> -> vector<4x16xf32>
    %c0_18 = arith.constant 0 : index
    %c0_19 = arith.constant 0 : index
    %29 = vector.load %arg6[%c0_18, %c0_19] : memref<4x3xf32, #tpu.memory_space<vmem>>, vector<4x3xf32>
    %30 = vector.extract_strided_slice %29 {offsets = [0, 0], sizes = [4, 1], strides = [1, 1]} : vector<4x3xf32> to vector<4x1xf32>
    %31 = vector.broadcast %30 : vector<4x1xf32> to vector<4x16xf32>
    %32 = arith.mulf %31, %26 : vector<4x16xf32>
    %33 = vector.extract_strided_slice %29 {offsets = [0, 1], sizes = [4, 1], strides = [1, 1]} : vector<4x3xf32> to vector<4x1xf32>
    %34 = vector.broadcast %33 : vector<4x1xf32> to vector<4x16xf32>
    %35 = arith.mulf %34, %23 : vector<4x16xf32>
    %36 = arith.addf %32, %35 : vector<4x16xf32>
    %37 = vector.extract_strided_slice %29 {offsets = [0, 2], sizes = [4, 1], strides = [1, 1]} : vector<4x3xf32> to vector<4x1xf32>
    %38 = vector.broadcast %37 : vector<4x1xf32> to vector<4x16xf32>
    %39 = arith.mulf %38, %28 : vector<4x16xf32>
    %40 = arith.addf %36, %39 : vector<4x16xf32>
    %c0_20 = arith.constant 0 : index
    %c0_21 = arith.constant 0 : index
    %41 = vector.load %arg7[%c0_20, %c0_21] : memref<4x1xf32, #tpu.memory_space<vmem>>, vector<4x1xf32>
    %42 = vector.broadcast %41 : vector<4x1xf32> to vector<4x16xf32>
    %43 = arith.addf %40, %42 : vector<4x16xf32>
    %44 = arith.negf %43 : vector<4x16xf32>
    %45 = math.exp %44 : vector<4x16xf32>
    %cst_22 = arith.constant 1.000000e+00 : f32
    %46 = vector.broadcast %cst_22 : f32 to vector<4x16xf32>
    %47 = arith.addf %46, %45 : vector<4x16xf32>
    %48 = arith.divf %46, %47 : vector<4x16xf32>
    %49 = arith.mulf %43, %48 : vector<4x16xf32>
    %c0_23 = arith.constant 0 : index
    %c0_24 = arith.constant 0 : index
    %50 = vector.load %arg8[%c0_23, %c0_24] : memref<4x4xf32, #tpu.memory_space<vmem>>, vector<4x4xf32>
    %c0_25 = arith.constant 0 : index
    %c0_26 = arith.constant 0 : index
    %51 = vector.load %arg9[%c0_25, %c0_26] : memref<4x1xf32, #tpu.memory_space<vmem>>, vector<4x1xf32>
    %52 = vector.shape_cast %50 : vector<4x4xf32> to vector<4x4x1xf32>
    %53 = vector.shape_cast %49 : vector<4x16xf32> to vector<1x4x16xf32>
    %54 = vector.broadcast %52 : vector<4x4x1xf32> to vector<4x4x16xf32>
    %55 = vector.broadcast %53 : vector<1x4x16xf32> to vector<4x4x16xf32>
    %56 = arith.mulf %54, %55 : vector<4x4x16xf32>
    %cst_27 = arith.constant dense<0.000000e+00> : vector<4x16xf32>
    %57 = vector.multi_reduction <add>, %56, %cst_27 [1] : vector<4x4x16xf32> to vector<4x16xf32>
    %58 = vector.broadcast %51 : vector<4x1xf32> to vector<4x16xf32>
    %59 = arith.addf %57, %58 : vector<4x16xf32>
    %60 = arith.addf %1, %20 : vector<4x20x16xf32>
    %61 = vector.shape_cast %59 : vector<4x16xf32> to vector<4x1x16xf32>
    %62 = vector.broadcast %61 : vector<4x1x16xf32> to vector<4x20x16xf32>
    %63 = arith.addf %60, %62 : vector<4x20x16xf32>
    %cst_28 = arith.constant 0.000000e+00 : f32
    %64 = vector.broadcast %cst_28 : f32 to vector<4x20x16xf32>
    %65 = arith.maximumf %63, %64 : vector<4x20x16xf32>
    %c0_29 = arith.constant 0 : index
    %c0_30 = arith.constant 0 : index
    %c0_31 = arith.constant 0 : index
    %c0_32 = arith.constant 0 : index
    %66 = vector.load %arg10[%c0_29, %c0_30, %c0_31, %c0_32] : memref<1x4x20x16xf32, #tpu.memory_space<vmem>>, vector<1x4x20x16xf32>
    %67 = vector.shape_cast %66 : vector<1x4x20x16xf32> to vector<4x20x16xf32>
    %68 = vector.shape_cast %65 : vector<4x20x16xf32> to vector<1x4x20x16xf32>
    tpu.vector_store %arg10[%c0_29, %c0_30, %c0_31, %c0_32], %68 {strides = array<i32>} : memref<1x4x20x16xf32, #tpu.memory_space<vmem>>, vector<1x4x20x16xf32>,
    return
  }
  func.func @transform_0(%arg0: i32) -> (i32, i32, i32, i32) {
    %c0_i32 = arith.constant 0 : i32
    %c0_i32_0 = arith.constant 0 : i32
    %c0_i32_1 = arith.constant 0 : i32
    %c0_i32_2 = arith.constant 0 : i32
    return %arg0, %c0_i32, %c0_i32_0, %c0_i32_1 : i32, i32, i32, i32
  }
  func.func @transform_1(%arg0: i32) -> (i32, i32, i32) {
    %c0_i32 = arith.constant 0 : i32
    %c0_i32_0 = arith.constant 0 : i32
    %c0_i32_1 = arith.constant 0 : i32
    %c0_i32_2 = arith.constant 0 : i32
    return %c0_i32, %c0_i32_0, %c0_i32_1 : i32, i32, i32
  }
  func.func @transform_2(%arg0: i32) -> (i32, i32, i32) {
    %c0_i32 = arith.constant 0 : i32
    %c0_i32_0 = arith.constant 0 : i32
    %c0_i32_1 = arith.constant 0 : i32
    %c0_i32_2 = arith.constant 0 : i32
    return %c0_i32, %c0_i32_0, %c0_i32_1 : i32, i32, i32
  }
  func.func @transform_3(%arg0: i32) -> (i32, i32, i32) {
    %c0_i32 = arith.constant 0 : i32
    %c0_i32_0 = arith.constant 0 : i32
    %c0_i32_1 = arith.constant 0 : i32
    %c0_i32_2 = arith.constant 0 : i32
    return %c0_i32, %c0_i32_0, %c0_i32_1 : i32, i32, i32
  }
  func.func @transform_4(%arg0: i32) -> (i32, i32, i32) {
    %c0_i32 = arith.constant 0 : i32
    %c0_i32_0 = arith.constant 0 : i32
    %c0_i32_1 = arith.constant 0 : i32
    %c0_i32_2 = arith.constant 0 : i32
    return %c0_i32, %c0_i32_0, %c0_i32_1 : i32, i32, i32
  }
  func.func @transform_5(%arg0: i32) -> (i32, i32) {
    %c0_i32 = arith.constant 0 : i32
    %c0_i32_0 = arith.constant 0 : i32
    %c0_i32_1 = arith.constant 0 : i32
    return %c0_i32, %c0_i32_0 : i32, i32
  }
  func.func @transform_6(%arg0: i32) -> (i32, i32) {
    %c0_i32 = arith.constant 0 : i32
    %c0_i32_0 = arith.constant 0 : i32
    %c0_i32_1 = arith.constant 0 : i32
    return %c0_i32, %c0_i32_0 : i32, i32
  }
  func.func @transform_7(%arg0: i32) -> (i32, i32) {
    %c0_i32 = arith.constant 0 : i32
    %c0_i32_0 = arith.constant 0 : i32
    %c0_i32_1 = arith.constant 0 : i32
    return %c0_i32, %c0_i32_0 : i32, i32
  }
  func.func @transform_8(%arg0: i32) -> (i32, i32) {
    %c0_i32 = arith.constant 0 : i32
    %c0_i32_0 = arith.constant 0 : i32
    %c0_i32_1 = arith.constant 0 : i32
    return %c0_i32, %c0_i32_0 : i32, i32
  }
  func.func @transform_9(%arg0: i32) -> (i32, i32, i32, i32) {
    %c0_i32 = arith.constant 0 : i32
    %c0_i32_0 = arith.constant 0 : i32
    %c0_i32_1 = arith.constant 0 : i32
    %c0_i32_2 = arith.constant 0 : i32
    return %arg0, %c0_i32, %c0_i32_0, %c0_i32_1 : i32, i32, i32, i32
  }
}

</mosaic_0001>

<bundles_post_ra>
// kernel: tpu_custom_call.1
= control target key start
LH: loop header
LB: loop body
LE: loop exit
PB: predicated region body
PF: predicated region fallthrough
CT: control target
= control target key end

     0   :  { %s1206_s30 = smov 0   ;;  %s1655_s0 = inlined_call_operand.vmem [shape: f32[2,4,20,16], index: 0, kind: input, shape index: {}]   ;;  %s1656_s1 = inlined_call_operand.vmem [shape: f32[4,20,1], index: 1, kind: input, shape index: {}]   ;;  %s1657_s2 = inlined_call_operand.vmem [shape: f32[4,20,1], index: 2, kind: input, shape index: {}]   ;;  %s1658_s3 = inlined_call_operand.vmem [shape: f32[4,20,1], index: 3, kind: input, shape index: {}]   ;;  %s1659_s4 = inlined_call_operand.vmem [shape: f32[4,20,1], index: 4, kind: input, shape index: {}]   ;;  %s1660_s5 = inlined_call_operand.vmem [shape: f32[4,3], index: 5, kind: input, shape index: {}]   ;;  %s1661_s6 = inlined_call_operand.vmem [shape: f32[4,1], index: 6, kind: input, shape index: {}]   ;;  %s1662_s7 = inlined_call_operand.vmem [shape: f32[4,4], index: 7, kind: input, shape index: {}]   ;;  %s1663_s8 = inlined_call_operand.vmem [shape: f32[4,1], index: 8, kind: input, shape index: {}]   ;;  %s1664_s9 = inlined_call_operand.vmem [shape: f32[2,4,20,16], index: 9, kind: output, shape index: {}]  }
   0x1 LB: > { %s1100_s10 = sadd.s32 4294967295, %s1148_s30   ;;  %p1104_p0 = scmp.ge.s32.totalorder %s1148_s30, 1  ;;  %s1148_s30 = sphi %s1206_s30, %s19_s30  }
   0x2   : > { %p287_p1 = scmp.lt.s32.totalorder %s1148_s30, 3 }
   0x4   : > { %p288_p2 = pnand %p1104_p0, %p287_p1 }
   0x5   : > { %p323_p3 = scmp.lt.s32.totalorder (!%p288_p2), %s1100_s10, 1  ;;  %s1154_s25 = smov (!%p288_p2), 1  }
   0x6   : > { %291 = sbr.rel (%p288_p2) target bundleno = 467 (0x1d3), region = 56  ;;  %s1155_s26 = smov (!%p288_p2), 127  }
   0xb   : > { %v436_v0 = vld [vmem:[%s1656_s1 + $0x20] sm:$0xff]  ;;  %v434_v1 = vld [vmem:[%s1656_s1 + $0x10] sm:$0xf]  ;;  %v1150_v3 = vmov 0   ;;  %v437_v4 = vld [vmem:[%s1656_s1 + $0x28] sm:$0xf] }
   0xc   : > { %v432_v2 = vld [vmem:[%s1656_s1] sm:$0xff]  ;;  %1127 = vset.pattern.permute.xlu2 %v1150_v3  ;;  %1126 = vset.pattern.permute.xlu1 %v1150_v3  ;;  %v435_v5 = vld [vmem:[%s1656_s1 + $0x18] sm:$0xff]  ;;  %v433_v6 = vld [vmem:[%s1656_s1 + $0x8] sm:$0xff]  ;;  %s1666_s10 = smov (!%p323_p3, %s1100_s10), 1  ;;  %vm357_vm0 = vcmask 1040384   ;;  %vm394_vm1 = vcmask 1046528  }
   0xd   : > { %1125 = vset.pattern.permute.xlu0 %v1150_v3  ;;  %466 = vperm.xlu2 %1127, %v436_v0   ;;  %v440_v7 = vld [vmem:[%s1656_s1 + $0x40] sm:$0xf]  ;;  %v439_v8 = vld [vmem:[%s1656_s1 + $0x38] sm:$0xff]  ;;  %v438_v9 = vld [vmem:[%s1656_s1 + $0x30] sm:$0xff]  ;;  %s1110_s19 = smul.u32 96, %s1666_s10  ;;  %vm427_vm2 = vcmask 1042432  }
   0xe   : > { %456 = vperm.xlu1 %1126, %v434_v1   ;;  %446 = vperm.xlu0 %1125, %v432_v2   ;;  %v443_v10 = vld [vmem:[%s1656_s1 + $0x58] sm:$0xf]  ;;  %v442_v11 = vld [vmem:[%s1656_s1 + $0x50] sm:$0xff]  ;;  %v441_v12 = vld [vmem:[%s1656_s1 + $0x48] sm:$0xff]  ;;  %vm792_vm3 = vcmask 130048   ;;  %vm796_vm4 = vcmask 125952  }
   0xf   : > { %v518_v13 = vld [vmem:[%s1657_s2 + $0x10] sm:$0xf]  ;;  %v517_v14 = vld [vmem:[%s1657_s2 + $0x8] sm:$0xff]  ;;  %v516_v15 = vld [vmem:[%s1657_s2] sm:$0xff]  ;;  %s1360_s24 = scalar_lea.vmem %s1655_s0, %s1110_s19  ;;  %vm853_vm6 = vcmask 1041409   ;;  %vm855_vm7 = vcmask 1042434   ;;  %s332_s29 = scalar_lea.vmem %s1664_s9, %s1110_s19 }
  0x10   : > { %v521_v16 = vld [vmem:[%s1657_s2 + $0x28] sm:$0xf]  ;;  %v520_v17 = vld [vmem:[%s1657_s2 + $0x20] sm:$0xff]  ;;  %v519_v18 = vld [vmem:[%s1657_s2 + $0x18] sm:$0xff]  ;;  %vm857_vm8 = vcmask 1043459   ;;  %vm862_vm9 = vcmask 7168  }
  0x11   : > { %v524_v19 = vld [vmem:[%s1657_s2 + $0x40] sm:$0xf]  ;;  %v523_v20 = vld [vmem:[%s1657_s2 + $0x38] sm:$0xff]  ;;  %v522_v21 = vld [vmem:[%s1657_s2 + $0x30] sm:$0xff]  ;;  %vm867_vm10 = vcmask 121856  }
  0x12   : > { %v527_v22 = vld [vmem:[%s1657_s2 + $0x58] sm:$0xf]  ;;  %v526_v23 = vld [vmem:[%s1657_s2 + $0x50] sm:$0xff]  ;;  %v525_v24 = vld [vmem:[%s1657_s2 + $0x48] sm:$0xff] }
  0x13   : > { %v614_v25 = vld [vmem:[%s1658_s3 + $0x10] sm:$0xf]  ;;  %v613_v26 = vld [vmem:[%s1658_s3 + $0x8] sm:$0xff]  ;;  %v612_v27 = vld [vmem:[%s1658_s3] sm:$0xff] }
  0x14   : > { %v617_v28 = vld [vmem:[%s1658_s3 + $0x28] sm:$0xf]  ;;  %v616_v29 = vld [vmem:[%s1658_s3 + $0x20] sm:$0xff]  ;;  %v615_v30 = vld [vmem:[%s1658_s3 + $0x18] sm:$0xff] }
  0x15   : > { %471 = vperm.xlu2 %1127, %v437_v4   ;;  %v621_v31 = vld [vmem:[%s1658_s3 + $0x48] sm:$0xff]  ;;  %v619_v32 = vld [vmem:[%s1658_s3 + $0x38] sm:$0xff]  ;;  %v618_v33 = vld [vmem:[%s1658_s3 + $0x30] sm:$0xff] }
  0x16   : > { %461 = vperm.xlu1 %1126, %v435_v5   ;;  %451 = vperm.xlu0 %1125, %v433_v6   ;;  %v623_v34 = vld [vmem:[%s1658_s3 + $0x58] sm:$0xf]  ;;  %v620_v35 = vld [vmem:[%s1658_s3 + $0x40] sm:$0xf]  ;;  %v622_v36 = vld [vmem:[%s1658_s3 + $0x50] sm:$0xff] }
  0x17   : > { %v711_v38 = vld [vmem:[%s1659_s4 + $0x18] sm:$0xff]  ;;  %v709_v39 = vld [vmem:[%s1659_s4 + $0x8] sm:$0xff]  ;;  %v708_v40 = vld [vmem:[%s1659_s4] sm:$0xff] }
  0x18   : > { %v715_v42 = vld [vmem:[%s1659_s4 + $0x38] sm:$0xff]  ;;  %v714_v43 = vld [vmem:[%s1659_s4 + $0x30] sm:$0xff]  ;;  %v712_v44 = vld [vmem:[%s1659_s4 + $0x20] sm:$0xff] }
  0x19   : > { %v717_v46 = vld [vmem:[%s1659_s4 + $0x48] sm:$0xff]  ;;  %v710_v48 = vld [vmem:[%s1659_s4 + $0x10] sm:$0xf]  ;;  %v719_v56 = vld [vmem:[%s1659_s4 + $0x58] sm:$0xf] }
  0x1a   : > { %v713_v47 = vld [vmem:[%s1659_s4 + $0x28] sm:$0xf]  ;;  %v1372_v50 = vld [vmem:[%s1360_s24 + $0x10] sm:$0xf]  ;;  %v716_v57 = vld [vmem:[%s1659_s4 + $0x40] sm:$0xf] }
  0x1b   : > { %v1369_v49 = vld [vmem:[%s1360_s24 + $0x8] sm:$0xff]  ;;  %v361_v55 = vrot.slane %v1372_v50, 7  ;;  %v718_v58 = vld [vmem:[%s1659_s4 + $0x50] sm:$0xff]  ;;  %v1389_v60 = vld [vmem:[%s1360_s24 + $0x20] sm:$0xff] }
  0x1c   : > { %v359_v54 = vrot.slane %v1369_v49, 7  ;;  %v1392_v61 = vld [vmem:[%s1360_s24 + $0x28] sm:$0xf]  ;;  %v364_v4 = vrot.slane %v1389_v60, 7 }
  0x1d   : > { %486 = vperm.xlu2 %1127, %v440_v7   ;;  %v366_v5 = vrot.slane %v1392_v61, 7  ;;  %v1402_v7 = vld [vmem:[%s1660_s5] sm:$0xf] }
  0x1e   : > { %481 = vperm.xlu1 %1126, %v439_v8   ;;  %476 = vperm.xlu0 %1125, %v438_v9   ;;  %v362_v59 = vsel %vm357_vm0, %v359_v54, %v361_v55  ;;  %v1406_v9 = vld [vmem:[%s1360_s24 + $0x38] sm:$0xff] }
  0x1f   : > { %v367_v8 = vsel %vm357_vm0, %v364_v4, %v366_v5 }
  0x25   : > { %501 = vperm.xlu2 %1127, %v443_v10   ;;  %v1409_v10 = vld [vmem:[%s1360_s24 + $0x40] sm:$0xf] }
  0x26   : > { %496 = vperm.xlu1 %1126, %v442_v11   ;;  %491 = vperm.xlu0 %1125, %v441_v12  }
  0x2d   : > { %540 = vperm.xlu2 %1127, %v518_v13  }
  0x2e   : > { %535 = vperm.xlu1 %1126, %v517_v14   ;;  %530 = vperm.xlu0 %1125, %v516_v15  }
  0x35   : > { %555 = vperm.xlu2 %1127, %v521_v16   ;;  %v369_v16 = vrot.slane %v1406_v9, 7 }
  0x36   : > { %550 = vperm.xlu1 %1126, %v520_v17   ;;  %545 = vperm.xlu0 %1125, %v519_v18   ;;  %v371_v17 = vrot.slane %v1409_v10, 7 }
  0x3d   : > { %570 = vperm.xlu2 %1127, %v524_v19   ;;  %v1151_v19 = vmov 1  }
  0x3e   : > { %565 = vperm.xlu1 %1126, %v523_v20   ;;  %560 = vperm.xlu0 %1125, %v522_v21   ;;  %v372_v20 = vsel %vm357_vm0, %v369_v16, %v371_v17  ;;  %v1420_v21 = vld [vmem:[%s1360_s24] sm:$0xff] }
  0x45   : > { %585 = vperm.xlu2 %1127, %v527_v22  }
  0x46   : > { %580 = vperm.xlu1 %1126, %v526_v23   ;;  %575 = vperm.xlu0 %1125, %v525_v24  }
  0x4d   : > { %636 = vperm.xlu2 %1127, %v614_v25  }
  0x4e   : > { %631 = vperm.xlu1 %1126, %v613_v26   ;;  %626 = vperm.xlu0 %1125, %v612_v27   ;;  %v358_v27 = vrot.slane %v1420_v21, 7 }
  0x55   : > { %651 = vperm.xlu2 %1127, %v617_v28  }
  0x56   : > { %646 = vperm.xlu1 %1126, %v616_v29   ;;  %641 = vperm.xlu0 %1125, %v615_v30   ;;  %v390_v29 = vsel %vm357_vm0, 0.0, %v358_v27  ;;  %v360_v30 = vsel %vm357_vm0, %v358_v27, %v359_v54  ;;  %v395_v27 = vrot.slane %v1420_v21, 1 }
  0x5d   : > { %671 = vperm.xlu2 %1127, %v621_v31   ;;  %v1434_v31 = vld [vmem:[%s1360_s24 + $0x18] sm:$0xff] }
  0x5e   : > { %661 = vperm.xlu1 %1126, %v619_v32   ;;  %656 = vperm.xlu0 %1125, %v618_v33  }
  0x65   : > { %681 = vperm.xlu2 %1127, %v623_v34  }
  0x66   : > { %666 = vperm.xlu1 %1126, %v620_v35   ;;  %676 = vperm.xlu0 %1125, %v622_v36  }
  0x67   : > { %v1325_v37 = vpop.permute.xlu2 %466 }
  0x6d   : > { %737 = vperm.xlu2 %1127, %v711_v38  }
  0x6e   : > { %727 = vperm.xlu1 %1126, %v709_v39   ;;  %722 = vperm.xlu0 %1125, %v708_v40   ;;  %v363_v39 = vrot.slane %v1434_v31, 7 }
  0x6f   : > { %v472_v41 = vpop.permute.xlu2 %471 }
  0x70   : > { %v509_v12 = vmul.f32 %v472_v41, %v367_v8 }
  0x75   : > { %757 = vperm.xlu2 %1127, %v715_v42  }
  0x76   : > { %752 = vperm.xlu1 %1126, %v714_v43   ;;  %742 = vperm.xlu0 %1125, %v712_v44   ;;  %v365_v43 = vsel %vm357_vm0, %v363_v39, %v364_v4  ;;  %v391_v44 = vsel %vm357_vm0, 0.0, %v363_v39 }
  0x77   : > { %v487_v45 = vpop.permute.xlu2 %486 }
  0x78   : > { %v512_v23 = vmul.f32 %v487_v45, %v372_v20  ;;  %v1444_v45 = vld [vmem:[%s1360_s24 + $0x30] sm:$0xff] }
  0x79   : > { %v368_v55 = vrot.slane %v1444_v45, 7 }
  0x7d   : > { %767 = vperm.xlu2 %1127, %v717_v46  }
  0x7e   : > { %747 = vperm.xlu1 %1126, %v713_v47   ;;  %732 = vperm.xlu0 %1125, %v710_v48   ;;  %v508_v48 = vmul.f32 %v1325_v37, %v365_v43 }
  0x7f   : > { %v1374_v51 = vpop.permute.xlu2 %501 }
  0x80   : > { %v457_v52 = vpop.permute.xlu1 %456  ;;  %v447_v53 = vpop.permute.xlu0 %446 }
  0x81   : > { %v506_v63 = vmul.f32 %v457_v52, %v362_v59  ;;  %v504_v34 = vmul.f32 %v447_v53, %v390_v29  ;;  %v392_v59 = vsel %vm357_vm0, 0.0, %v368_v55  ;;  %v398_v29 = vrot.slane %v1372_v50, 1 }
  0x85   : > { %777 = vperm.xlu2 %1127, %v719_v56  }
  0x86   : > { %762 = vperm.xlu1 %1126, %v716_v57   ;;  %772 = vperm.xlu0 %1125, %v718_v58   ;;  %v370_v58 = vsel %vm357_vm0, %v368_v55, %v369_v16 }
  0x87   : > { %v541_v62 = vpop.permute.xlu2 %540 }
  0x88   : > { %v590_v0 = vmul.f32 %v541_v62, %v1372_v50  ;;  %v462_v1 = vpop.permute.xlu1 %461  ;;  %v452_v2 = vpop.permute.xlu0 %451 }
  0x89   : > { %v505_v35 = vmul.f32 %v452_v2, %v360_v30  ;;  %v507_v52 = vmul.f32 %v462_v1, %v391_v44 }
  0x8a   : > { %v1397_v6 = vadd.f32 %v590_v0, %v506_v63 }
  0x8d   : > { %1128 = vset.pattern.permute.xlu2 %v1151_v19 }
  0x8e   : > { %872 = vperm.xlu1 %1126, %v1402_v7   ;;  %877 = vperm.xlu2 %1128, %v1402_v7  }
  0x8f   : > { %v556_v11 = vpop.permute.xlu2 %555 }
  0x90   : > { %v593_v13 = vmul.f32 %v556_v11, %v1392_v61  ;;  %v482_v14 = vpop.permute.xlu1 %481  ;;  %v477_v15 = vpop.permute.xlu0 %476 }
  0x91   : > { %v511_v2 = vmul.f32 %v482_v14, %v370_v58  ;;  %v510_v37 = vmul.f32 %v477_v15, %v392_v59 }
  0x92   : > { %v1415_v18 = vadd.f32 %v593_v13, %v509_v12 }
  0x96   : > { %1130 = vset.pattern.permute.xlu2 %v1150_v3 }
  0x97   : > { %v571_v22 = vpop.permute.xlu2 %570 }
  0x98   : > { %v596_v24 = vmul.f32 %v571_v22, %v1409_v10  ;;  %v1423_v25 = vpop.permute.xlu1 %496  ;;  %v1425_v26 = vpop.permute.xlu0 %491 }
  0x9a   : > { %v1428_v28 = vadd.f32 %v596_v24, %v512_v23  ;;  %v396_v24 = vrot.slane %v1369_v49, 1 }
  0x9f   : > { %v1439_v42 = vpop.permute.xlu2 %585 }
  0xa0   : > { %v536_v32 = vpop.permute.xlu1 %535  ;;  %v531_v33 = vpop.permute.xlu0 %530 }
  0xa1   : > { %v589_v36 = vmul.f32 %v536_v32, %v1369_v49  ;;  %v588_v38 = vmul.f32 %v531_v33, %v1420_v21  ;;  %v401_v32 = vrot.slane %v1389_v60, 1  ;;  %v400_v33 = vrot.slane %v1434_v31, 1 }
  0xa3   : > { %v601_v40 = vadd.f32 %v589_v36, %v505_v35  ;;  %v600_v41 = vadd.f32 %v588_v38, %v504_v34  ;;  %v399_v34 = vsel %vm394_vm1, %v396_v24, %v398_v29  ;;  %v397_v35 = vsel %vm394_vm1, %v395_v27, %v396_v24 }
  0xa4   : > { %v406_v36 = vrot.slane %v1406_v9, 1  ;;  %v408_v38 = vrot.slane %v1409_v10, 1 }
  0xa7   : > { %v1454_v62 = vpop.permute.xlu2 %636 }
  0xa8   : > { %v551_v46 = vpop.permute.xlu1 %550  ;;  %v546_v47 = vpop.permute.xlu0 %545 }
  0xa9   : > { %v592_v53 = vmul.f32 %v551_v46, %v1389_v60  ;;  %v591_v54 = vmul.f32 %v546_v47, %v1434_v31  ;;  %v402_v47 = vsel %vm394_vm1, %v400_v33, %v401_v32  ;;  %v1503_v33 = vld [vmem:[%s1360_s24 + $0x50] sm:$0xff] }
  0xab   : > { %v1450_v56 = vadd.f32 %v592_v53, %v508_v48  ;;  %v603_v57 = vadd.f32 %v591_v54, %v507_v52  ;;  %v405_v48 = vrot.slane %v1444_v45, 1  ;;  %v403_v52 = vrot.slane %v1392_v61, 1 }
  0xac   : > { %v409_v53 = vsel %vm394_vm1, %v406_v36, %v408_v38 }
  0xad   : > { %v404_v54 = vsel %vm394_vm1, %v401_v32, %v403_v52  ;;  %v407_v59 = vsel %vm394_vm1, %v405_v48, %v406_v36 }
  0xaf   : > { %v1462_v13 = vpop.permute.xlu2 %651 }
  0xb0   : > { %v566_v63 = vpop.permute.xlu1 %565  ;;  %v561_v0 = vpop.permute.xlu0 %560 }
  0xb1   : > { %v595_v1 = vmul.f32 %v566_v63, %v1406_v9  ;;  %v594_v4 = vmul.f32 %v561_v0, %v1444_v45 }
  0xb3   : > { %v607_v5 = vadd.f32 %v595_v1, %v511_v2  ;;  %v606_v8 = vadd.f32 %v594_v4, %v510_v37 }
  0xb7   : > { %v1464_v19 = vpop.permute.xlu2 %671 }
  0xb8   : > { %v1458_v11 = vpop.permute.xlu1 %580  ;;  %v1460_v12 = vpop.permute.xlu0 %575 }
  0xbf   : > { %v1466_v14 = vpop.permute.xlu2 %681 }
  0xc0   : > { %v632_v16 = vpop.permute.xlu1 %631  ;;  %v627_v17 = vpop.permute.xlu0 %626 }
  0xc1   : > { %v685_v44 = vmul.f32 %v632_v16, %v399_v34  ;;  %v684_v46 = vmul.f32 %v627_v17, %v397_v35  ;;  %v1494_v16 = vld [vmem:[%s1360_s24 + $0x48] sm:$0xff]  ;;  %v1506_v34 = vld [vmem:[%s1360_s24 + $0x58] sm:$0xf] }
  0xc2   : > { %v373_v35 = vrot.slane %v1494_v16, 7  ;;  %v376_v48 = vrot.slane %v1506_v34, 7 }
  0xc3   : > { %v697_v63 = vadd.f32 %v685_v44, %v601_v40  ;;  %v696_v0 = vadd.f32 %v684_v46, %v600_v41 }
  0xc7   : > { %v738_v30 = vpop.permute.xlu2 %737 }
  0xc8   : > { %v647_v20 = vpop.permute.xlu1 %646  ;;  %v642_v22 = vpop.permute.xlu0 %641 }
  0xc9   : > { %v687_v55 = vmul.f32 %v642_v22, %v402_v47  ;;  %v688_v17 = vmul.f32 %v647_v20, %v404_v54  ;;  %v429_v20 = vsel %vm427_vm2, %v403_v52, 0.0  ;;  %v374_v47 = vrot.slane %v1503_v33, 7 }
  0xcb   : > { %v699_v24 = vadd.f32 %v687_v55, %v603_v57  ;;  %v428_v57 = vsel %vm427_vm2, %v398_v29, 0.0  ;;  %v700_v46 = vadd.f32 %v688_v17, %v1450_v56  ;;  %v393_v55 = vsel %vm357_vm0, 0.0, %v373_v35 }
  0xcc   : > { %v410_v29 = vrot.slane %v1494_v16, 1  ;;  %v411_v56 = vrot.slane %v1503_v33, 1 }
  0xcf   : > { %v758_v27 = vpop.permute.xlu2 %757 }
  0xd0   : > { %v662_v15 = vpop.permute.xlu1 %661  ;;  %v657_v23 = vpop.permute.xlu0 %656 }
  0xd1   : > { %v691_v58 = vmul.f32 %v662_v15, %v409_v53  ;;  %v690_v22 = vmul.f32 %v657_v23, %v407_v59  ;;  %v1152_v23 = vmov 20.0   ;;  %v413_v59 = vrot.slane %v1506_v34, 1 }
  0xd2   : > { %1136 = vrcp.f32 %v1152_v23 }
  0xd3   : > { %v703_v15 = vadd.f32 %v691_v58, %v607_v5  ;;  %v1511_v5 = vadd.f32 %v738_v30, %v699_v24  ;;  %v702_v44 = vadd.f32 %v690_v22, %v606_v8  ;;  %v686_v30 = vmul.f32 %v1454_v62, %v428_v57 }
  0xd4   : > { %v689_v8 = vmul.f32 %v1462_v13, %v429_v20  ;;  %v597_v62 = vmul.f32 %v1460_v12, %v1494_v16  ;;  %v377_v22 = vsel %vm357_vm0, %v374_v47, %v376_v48  ;;  %v431_v57 = vsel %vm427_vm2, %v413_v59, 0.0 }
  0xd5   : > { %v1513_v36 = vadd.f32 %v758_v27, %v703_v15  ;;  %v375_v15 = vsel %vm357_vm0, %v373_v35, %v374_v47  ;;  %v698_v20 = vadd.f32 %v686_v30, %v1397_v6  ;;  %v430_v12 = vsel %vm427_vm2, %v408_v38, 0.0 }
  0xd6   : > { %v701_v23 = vadd.f32 %v689_v8, %v1415_v18  ;;  %v599_v35 = vmul.f32 %v1439_v42, %v1506_v34  ;;  %v414_v47 = vsel %vm394_vm1, %v411_v56, %v413_v59  ;;  %v514_v6 = vmul.f32 %v1423_v25, %v375_v15 }
  0xd7   : > { %v768_v13 = vpop.permute.xlu2 %767  ;;  %v598_v38 = vmul.f32 %v1458_v11, %v1503_v33  ;;  %v695_v42 = vmul.f32 %v1466_v14, %v431_v57  ;;  %v919_v15 = vlaneseq }
  0xd8   : > { %v1477_v39 = vpop.permute.xlu1 %666  ;;  %v1479_v43 = vpop.permute.xlu0 %676 }
  0xd9   : > { %v1536_v17 = vpop.eup %1136  ;;  %v694_v30 = vmul.f32 %v1479_v43, %v414_v47 }
  0xda   : > { %vm843_vm5 = vweird.f32 %v1536_v17 }
  0xdf   : > { %v778_v14 = vpop.permute.xlu2 %777 }
  0xe0   : > { %v728_v2 = vpop.permute.xlu1 %727  ;;  %v723_v37 = vpop.permute.xlu0 %722 }
  0xe1   : > { %v1489_v1 = vadd.f32 %v728_v2, %v697_v63  ;;  %v1491_v4 = vadd.f32 %v723_v37, %v696_v0  ;;  %v817_v0 = vsel %vm792_vm3, %v1513_v36, 0.0  ;;  %v805_v2 = vsel %vm792_vm3, %v1511_v5, 0.0 }
  0xe3   : > { %v794_v40 = vsel %vm792_vm3, %v1489_v1, 0.0  ;;  %v793_v41 = vsel %vm792_vm3, %v1491_v4, 0.0 }
  0xe4   : > { %v1500_v32 = vadd.f32 %v794_v40, %v793_v41  ;;  %v513_v40 = vmul.f32 %v1425_v26, %v393_v55  ;;  %v412_v41 = vsel %vm394_vm1, %v410_v29, %v411_v56  ;;  %v692_v29 = vmul.f32 %v1477_v39, %v430_v12 }
  0xe6   : > { %v609_v26 = vadd.f32 %v597_v62, %v513_v40  ;;  %v704_v43 = vadd.f32 %v692_v29, %v1428_v28  ;;  %v889_v40 = vld [vmem:[%s1661_s6] sm:$0xf]  ;;  %v920_v28 = vshrl.u32 %v919_v15, 7 }
  0xe7   : > { %892 = vperm.xlu2 %1130, %v889_v40  }
  0xe8   : > { %v753_v53 = vpop.permute.xlu1 %752  ;;  %v743_v54 = vpop.permute.xlu0 %742  ;;  %1131 = vset.pattern.permute.xlu0 %v920_v28 }
  0xe9   : > { %v1520_v52 = vadd.f32 %v753_v53, %v702_v44  ;;  %v1522_v58 = vadd.f32 %v743_v54, %v700_v46  ;;  %v839_v44 = vmul.f32 20.0, %v1536_v17  ;;  %v515_v46 = vmul.f32 %v1374_v51, %v377_v22 }
  0xea   : > { %v1153_v54 = vmov 2   ;;  %v693_v51 = vmul.f32 %v1464_v19, %v412_v41  ;;  %v610_v19 = vadd.f32 %v598_v38, %v514_v6  ;;  %v916_v38 = vld [vmem:[%s1662_s7] sm:$0xf] }
  0xeb   : > { %v816_v63 = vsel %vm792_vm3, %v1520_v52, 0.0  ;;  %v806_v37 = vsel %vm792_vm3, %v1522_v58, 0.0  ;;  %1129 = vset.pattern.permute.xlu1 %v1153_v54  ;;  %v840_v8 = vsub.f32 1.0, %v839_v44  ;;  %v611_v56 = vadd.f32 %v599_v35, %v515_v46 }
  0xec   : > { %v1540_v24 = vadd.f32 %v817_v0, %v816_v63  ;;  %v807_v27 = vadd.f32 %v806_v37, %v805_v2  ;;  %884 = vperm.xlu1 %1129, %v1402_v7   ;;  %v705_v59 = vadd.f32 %v693_v51, %v609_v26  ;;  %v706_v62 = vadd.f32 %v694_v30, %v610_v19 }
  0xed   : > { %v707_v39 = vadd.f32 %v695_v42, %v611_v56  ;;  %v841_v22 = vmul.f32 %v1536_v17, %v840_v8  ;;  %v925_v8 = vperm.slane %v916_v38, 1  ;;  %v939_v40 = vperm.slane %v916_v38, 3 }
  0xee   : > { %v1574_v0 = vadd.f32 %v768_v13, %v705_v59 }
  0xef   : > { %v1581_v13 = vadd.f32 %v778_v14, %v707_v39  ;;  %v842_v47 = vadd.f32 %v1536_v17, %v841_v22  ;;  %1133 = vset.pattern.permute.xlu2 %v920_v28 }
  0xf0   : > { %v748_v48 = vpop.permute.xlu1 %747  ;;  %v733_v53 = vpop.permute.xlu0 %732 }
  0xf1   : > { %v1560_v18 = vadd.f32 %v748_v48, %v701_v23  ;;  %v1562_v55 = vadd.f32 %v733_v53, %v698_v20  ;;  %v827_v23 = vsel %vm792_vm3, %v1574_v0, 0.0  ;;  %v830_v51 = vsel %vm796_vm4, %v1581_v13, 0.0 }
  0xf3   : > { %v808_v25 = vsel %vm796_vm4, %v1560_v18, 0.0  ;;  %v797_v11 = vsel %vm796_vm4, %v1562_v55, 0.0 }
  0xf4   : > { %v809_v63 = vadd.f32 %v808_v25, %v807_v27  ;;  %v798_v7 = vadd.f32 %v797_v11, %v1500_v32  ;;  %1132 = vset.pattern.permute.xlu1 %v920_v28  ;;  %v844_v11 = vsel %vm843_vm5, %v1536_v17, %v842_v47  ;;  %v878_v47 = vpop.permute.xlu2 %877 }
  0xf6   : > { %v810_v2 = vrot.slane %v809_v63, 4  ;;  %v799_v37 = vrot.slane %v798_v7, 4 }
  0xf8   : > { %v811_v27 = vadd.f32 %v810_v2, %v809_v63  ;;  %v800_v41 = vadd.f32 %v799_v37, %v798_v7  ;;  %v763_v32 = vpop.permute.xlu1 %762  ;;  %v773_v57 = vpop.permute.xlu0 %772 }
  0xf9   : > { %v1583_v20 = vadd.f32 %v763_v32, %v704_v43  ;;  %v1585_v12 = vadd.f32 %v773_v57, %v706_v62  ;;  %v932_v62 = vperm.slane %v916_v38, 2 }
  0xfa   : > { %v812_v44 = vrot.slane %v811_v27, 2  ;;  %v801_v46 = vrot.slane %v800_v41, 2 }
  0xfb   : > { %v819_v35 = vsel %vm796_vm4, %v1583_v20, 0.0  ;;  %v828_v26 = vsel %vm792_vm3, %v1585_v12, 0.0  ;;  %937 = vperm.xlu2 %1133, %v932_v62  }
  0xfc   : > { %v813_v48 = vadd.f32 %v812_v44, %v811_v27  ;;  %v802_v53 = vadd.f32 %v801_v46, %v800_v41  ;;  %v820_v54 = vadd.f32 %v819_v35, %v1540_v24  ;;  %v829_v6 = vadd.f32 %v828_v26, %v827_v23  ;;  %930 = vperm.xlu1 %1132, %v925_v8   ;;  %v917_v44 = vld [vmem:[%s1663_s8] sm:$0xf] }
  0xfd   : > { %v918_v46 = vperm.slane %v916_v38, 0 }
  0xfe   : > { %v814_v42 = vrot.slane %v813_v48, 1  ;;  %v803_v29 = vrot.slane %v802_v53, 1  ;;  %v821_v30 = vrot.slane %v820_v54, 4  ;;  %v831_v25 = vadd.f32 %v830_v51, %v829_v6 }
 0x100   : > { %v815_v56 = vadd.f32 %v814_v42, %v813_v48  ;;  %v804_v59 = vadd.f32 %v803_v29, %v802_v53  ;;  %v822_v63 = vadd.f32 %v821_v30, %v820_v54  ;;  %v832_v7 = vrot.slane %v831_v25, 4  ;;  %v873_v35 = vpop.permute.xlu1 %872 }
 0x102   : > { %v823_v24 = vrot.slane %v822_v63, 2  ;;  %v833_v19 = vadd.f32 %v832_v7, %v831_v25  ;;  %v845_v14 = vmul.f32 %v844_v11, %v804_v59  ;;  %v846_v39 = vmul.f32 %v844_v11, %v815_v56 }
 0x103   : > { %1134 = vset.pattern.permute.xlu2 %v1150_v3 }
 0x104   : > { %v824_v2 = vadd.f32 %v823_v24, %v822_v63  ;;  %v834_v37 = vrot.slane %v833_v19, 2  ;;  %v854_v43 = vsel %vm853_vm6, %v846_v39, %v845_v14  ;;  %944 = vperm.xlu1 %1132, %v939_v40   ;;  %980 = vperm.xlu2 %1134, %v917_v44  }
 0x106   : > { %v825_v22 = vrot.slane %v824_v2, 1  ;;  %v835_v15 = vadd.f32 %v834_v37, %v833_v19 }
 0x108   : > { %v826_v17 = vadd.f32 %v825_v22, %v824_v2  ;;  %v836_v27 = vrot.slane %v835_v15, 1 }
 0x10a   : > { %v837_v41 = vadd.f32 %v836_v27, %v835_v15  ;;  %v847_v32 = vmul.f32 %v844_v11, %v826_v17 }
 0x10c   : > { %v848_v57 = vmul.f32 %v844_v11, %v837_v41  ;;  %v856_v28 = vsel %vm855_vm7, %v847_v32, %v854_v43 }
 0x10e   : > { %v858_v23 = vsel %vm857_vm8, %v848_v57, %v856_v28 }
 0x10f   : > { %859 = vrot.lane.b32.xlu0 %v858_v23, %s1154_s25  ;;  %v881_v6 = vmul.f32 %v878_v47, %v858_v23 }
 0x117   : > { %864 = vrot.lane.b32.xlu0 %v858_v23, %s1155_s26 }
 0x11f   : > { %923 = vperm.xlu0 %1131, %v918_v46  }
 0x127   : > { %1135 = vset.pattern.permute.xlu0 %v1150_v3 }
 0x141   : > { %v893_v25 = vpop.permute.xlu2 %892 }
 0x155   : > { %v938_v22 = vpop.permute.xlu2 %937 }
 0x15e   : > { %v885_v54 = vpop.permute.xlu1 %884 }
 0x16e   : > { %v931_v7 = vpop.permute.xlu1 %930 }
 0x176   : > { %v945_v17 = vpop.permute.xlu1 %944 }
 0x181   : > { %v860_v26 = vpop.permute.xlu0 %859 }
 0x182   : > { %v863_v48 = vsel %vm862_vm9, 0.0, %v860_v26 }
 0x183   : > { %v875_v53 = vmul.f32 %v873_v35, %v863_v48 }
 0x185   : > { %v882_v29 = vadd.f32 %v881_v6, %v875_v53 }
 0x189   : > { %v865_v51 = vpop.permute.xlu0 %864 }
 0x18a   : > { %v868_v42 = vsel %vm867_vm10, %v865_v51, 0.0 }
 0x18b   : > { %v887_v30 = vmul.f32 %v885_v54, %v868_v42 }
 0x18d   : > { %v888_v11 = vadd.f32 %v887_v30, %v882_v29 }
 0x18f   : > { %v895_v8 = vadd.f32 %v893_v25, %v888_v11  ;;  %v981_v11 = vpop.permute.xlu2 %980 }
 0x191   : > { %v1107_v38 = vmul.f32 -1.442695, %v895_v8  ;;  %v924_v15 = vpop.permute.xlu0 %923 }
 0x193   : > { %1138 = vpow2.f32 %v1107_v38 }
 0x199   : > { %v1139_v56 = vpop.eup %1138 }
 0x19a   : > { %v899_v3 = vadd.f32 1.0, %v1139_v56 }
 0x19c   : > { %1140 = vrcp.f32 %v899_v3  ;;  %v911_v19 = vand.u32 2147483648, %v899_v3  ;;  %v909_v39 = vand.u32 2147483647, %v899_v3  ;;  %vm905_vm12 = vweird.f32 %v899_v3 }
 0x19e   : > { %v912_v37 = vor.u32 1.1754944e-38, %v911_v19  ;;  %vm910_vm14 = vcmp.eq.f32.partialorder %v909_v39, 8.507059e+37 }
 0x1a2   : > { %v1141_v59 = vpop.eup %1140 }
 0x1a3   : > { %v901_v63 = vmul.f32 %v1141_v59, %v899_v3  ;;  %vm906_vm11 = vweird.f32 %v1141_v59 }
 0x1a4   : > { %vm907_vm13 = vmor %vm905_vm12, %vm906_vm11 }
 0x1a5   : > { %v902_v24 = vsub.f32 1.0, %v901_v63  ;;  %v983_v63 = vrot.slane %v981_v11, 2 }
 0x1a7   : > { %v903_v14 = vmul.f32 %v1141_v59, %v902_v24 }
 0x1a9   : > { %v904_v2 = vadd.f32 %v1141_v59, %v903_v14 }
 0x1ab   : > { %v908_v43 = vsel %vm907_vm13, %v1141_v59, %v904_v2  ;;  %v982_v59 = vrot.slane %v981_v11, 1 }
 0x1ac   : > { %v913_v62 = vsel %vm910_vm14, %v912_v37, %v908_v43 }
 0x1ad   : > { %v915_v40 = vmul.f32 %v913_v62, %v895_v8 }
 0x1af   : > { %v947_v27 = vmul.f32 %v931_v7, %v915_v40  ;;  %v949_v41 = vmul.f32 %v945_v17, %v915_v40  ;;  %v948_v32 = vmul.f32 %v938_v22, %v915_v40  ;;  %v946_v57 = vmul.f32 %v924_v15, %v915_v40 }
 0x1b0   : > { %v984_v7 = vrot.slane %v981_v11, 3  ;;  %v996_v22 = vadd.f32 %v1511_v5, %v1434_v31  ;;  %v1000_v15 = vadd.f32 %v1513_v36, %v1406_v9  ;;  %v1002_v40 = vadd.f32 %v1574_v0, %v1494_v16 }
 0x1b1   : > { %v957_v28 = vsel %vm796_vm4, %v947_v27, 0.0  ;;  %v971_v23 = vsel %vm796_vm4, %v949_v41, 0.0  ;;  %v964_v44 = vsel %vm796_vm4, %v948_v32, 0.0  ;;  %v950_v46 = vsel %vm796_vm4, %v946_v57, 0.0 }
 0x1b2   : > { %v958_v35 = vrot.slane %v957_v28, 4  ;;  %v972_v26 = vrot.slane %v971_v23, 4  ;;  %v965_v47 = vrot.slane %v964_v44, 4  ;;  %v951_v48 = vrot.slane %v950_v46, 4 }
 0x1b3   : > { %v1004_v17 = vadd.f32 %v1581_v13, %v1506_v34  ;;  %v999_v31 = vadd.f32 %v1520_v52, %v1444_v45  ;;  %v995_v9 = vadd.f32 %v1562_v55, %v1372_v50  ;;  %v997_v0 = vadd.f32 %v1522_v58, %v1389_v60 }
 0x1b4   : > { %v959_v53 = vadd.f32 %v958_v35, %v957_v28  ;;  %v973_v54 = vadd.f32 %v972_v26, %v971_v23  ;;  %v966_v6 = vadd.f32 %v965_v47, %v964_v44  ;;  %v952_v51 = vadd.f32 %v951_v48, %v950_v46 }
 0x1b5   : > { %v994_v28 = vadd.f32 %v1489_v1, %v1369_v49  ;;  %v993_v23 = vadd.f32 %v1491_v4, %v1420_v21  ;;  %v998_v49 = vadd.f32 %v1560_v18, %v1392_v61  ;;  %v1001_v21 = vadd.f32 %v1583_v20, %v1409_v10 }
 0x1b6   : > { %v960_v42 = vrot.slane %v959_v53, 2  ;;  %v974_v29 = vrot.slane %v973_v54, 2  ;;  %v967_v30 = vrot.slane %v966_v6, 2  ;;  %v953_v25 = vrot.slane %v952_v51, 2 }
 0x1b7   : > { %v1003_v45 = vadd.f32 %v1585_v12, %v1503_v33 }
 0x1b8   : > { %v961_v8 = vadd.f32 %v960_v42, %v959_v53  ;;  %v975_v38 = vadd.f32 %v974_v29, %v973_v54  ;;  %v968_v56 = vadd.f32 %v967_v30, %v966_v6  ;;  %v954_v3 = vadd.f32 %v953_v25, %v952_v51 }
 0x1ba   : > { %v962_v24 = vrot.slane %v961_v8, 1  ;;  %v976_v19 = vrot.slane %v975_v38, 1  ;;  %v969_v14 = vrot.slane %v968_v56, 1  ;;  %v955_v39 = vrot.slane %v954_v3, 1 }
 0x1bc   : > { %v956_v2 = vadd.f32 %v955_v39, %v954_v3  ;;  %v963_v37 = vadd.f32 %v962_v24, %v961_v8  ;;  %v970_v43 = vadd.f32 %v969_v14, %v968_v56  ;;  %v977_v62 = vadd.f32 %v976_v19, %v975_v38 }
 0x1be   : > { %v989_v27 = vadd.f32 %v981_v11, %v956_v2  ;;  %v990_v41 = vadd.f32 %v982_v59, %v963_v37  ;;  %v991_v32 = vadd.f32 %v983_v63, %v970_v43  ;;  %v992_v57 = vadd.f32 %v984_v7, %v977_v62 }
 0x1c0   : > { %v1005_v16 = vperm.slane %v989_v27, 0  ;;  %v1006_v5 = vperm.slane %v990_v41, 0  ;;  %v1007_v34 = vperm.slane %v991_v32, 0  ;;  %v1008_v36 = vperm.slane %v992_v57, 0 }
 0x1c2   : > { %v1009_v1 = vadd.f32 %v1005_v16, %v993_v23  ;;  %v1010_v4 = vadd.f32 %v1005_v16, %v994_v28  ;;  %v1011_v50 = vadd.f32 %v1005_v16, %v995_v9  ;;  %v1012_v52 = vadd.f32 %v1006_v5, %v996_v22 }
 0x1c3   : > { %v1013_v55 = vadd.f32 %v1006_v5, %v997_v0  ;;  %v1014_v13 = vadd.f32 %v1006_v5, %v998_v49  ;;  %v1015_v44 = vadd.f32 %v1007_v34, %v999_v31  ;;  %v1016_v46 = vadd.f32 %v1007_v34, %v1000_v15 }
 0x1c4   : > { %v1017_v60 = vadd.f32 %v1007_v34, %v1001_v21  ;;  %v1018_v61 = vadd.f32 %v1008_v36, %v1002_v40  ;;  %v1019_v58 = vadd.f32 %v1008_v36, %v1003_v45  ;;  %v1020_v10 = vadd.f32 %v1008_v36, %v1004_v17 }
 0x1c5   : > { %v1021_v18 = vmax.f32 %v1009_v1, 0.0  ;;  %v1022_v20 = vmax.f32 %v1010_v4, 0.0  ;;  %v1023_v33 = vmax.f32 %v1011_v50, 0.0  ;;  %v1024_v12 = vmax.f32 %v1012_v52, 0.0 }
 0x1c6   : > { %v1025_v35 = vmax.f32 %v1013_v55, 0.0  ;;  %v1026_v26 = vmax.f32 %v1014_v13, 0.0  ;;  %v1027_v47 = vmax.f32 %v1015_v44, 0.0  ;;  %v1028_v48 = vmax.f32 %v1016_v46, 0.0 }
 0x1c7   : > { %1033 = vst.msk [vmem:[%s332_s29] sm:$0xff] %vm792_vm3, %v1021_v18  ;;  %v1029_v53 = vmax.f32 %v1017_v60, 0.0  ;;  %v1030_v54 = vmax.f32 %v1018_v61, 0.0  ;;  %v1031_v6 = vmax.f32 %v1019_v58, 0.0  ;;  %v1032_v51 = vmax.f32 %v1020_v10, 0.0 }
 0x1c8   : > { %1034 = vst.msk [vmem:[%s332_s29 + $0x8] sm:$0xff] %vm792_vm3, %v1022_v20 }
 0x1c9   : > { %1035 = vst.msk [vmem:[%s332_s29 + $0x10] sm:$0xf] %vm796_vm4, %v1023_v33 }
 0x1ca   : > { %1036 = vst.msk [vmem:[%s332_s29 + $0x18] sm:$0xff] %vm792_vm3, %v1024_v12 }
 0x1cb   : > { %1037 = vst.msk [vmem:[%s332_s29 + $0x20] sm:$0xff] %vm792_vm3, %v1025_v35 }
 0x1cc   : > { %1038 = vst.msk [vmem:[%s332_s29 + $0x28] sm:$0xf] %vm796_vm4, %v1026_v26 }
 0x1cd   : > { %1039 = vst.msk [vmem:[%s332_s29 + $0x30] sm:$0xff] %vm792_vm3, %v1027_v47 }
 0x1ce   : > { %1040 = vst.msk [vmem:[%s332_s29 + $0x38] sm:$0xff] %vm792_vm3, %v1028_v48 }
 0x1cf   : > { %1041 = vst.msk [vmem:[%s332_s29 + $0x40] sm:$0xf] %vm796_vm4, %v1029_v53 }
 0x1d0   : > { %1042 = vst.msk [vmem:[%s332_s29 + $0x48] sm:$0xff] %vm792_vm3, %v1030_v54 }
 0x1d1   : > { %1043 = vst.msk [vmem:[%s332_s29 + $0x50] sm:$0xff] %vm792_vm3, %v1031_v6 }
 0x1d2   : > { %1044 = vst.msk [vmem:[%s332_s29 + $0x58] sm:$0xf] %vm796_vm4, %v1032_v51 }
 0x1d3 PF: > { %s19_s30 = sadd.s32 1, %s1148_s30  }
 0x1d4   : > { %p16_p4 = scmp.ge.s32.totalorder %s19_s30, 4  }
 0x1d6   :  { %18 = sbr.rel (!%p16_p4) target bundleno = 1 (0x1), region = 86 }

</bundles_post_ra>
